<compile_context>
chip_gen: v7x
topology: tpu7x:2x2x1
jax: 0.10.0
libtpu: 0.0.40
codegen_flags: <defaults>
</compile_context>

<pallas_src>
import jax
import jax.numpy as jnp
from jax.experimental import pallas as pl
from jax.experimental.pallas import tpu as pltpu


def _round_up(x, m):
    return (x + m - 1) // m * m


def _fused_linear_kernel(x_ref, w_ref, b_ref, mu_ref, lv_ref):
    # x_ref: [tb, F], w_ref: [F, 2L], b_ref: [1, 2L], mu_ref/lv_ref: [tb, L]
    acc = jnp.dot(x_ref[...], w_ref[...], preferred_element_type=jnp.float32)
    acc = acc + b_ref[...].astype(jnp.float32)
    latent = mu_ref.shape[-1]
    mu_ref[...] = acc[:, :latent].astype(mu_ref.dtype)
    lv_ref[...] = acc[:, latent:].astype(lv_ref.dtype)


def fuse_gaussian_params(w1, b1, w2, b2):
    """Fuse the two Linear heads into one weight/bias pair. Call this ONCE
    (outside the per-forward path) so the concat's HBM traffic is not repaid
    on every call.

    w1, w2 : [F, L] (already transposed relative to nn.Linear.weight)
    b1, b2 : [1, L]
    returns w_fused [F, 2L], b_fused [1, 2L]
    """
    w = jnp.concatenate([w1, w2], axis=1)
    b = jnp.concatenate([b1, b2], axis=1)
    return w, b


def gaussian_parametrizer(x, w_fused, b_fused, *, tb=None):
    """(mu, log_var) via one fused Pallas matmul writing two exact outputs.

    x       : [B, F]
    w_fused : [F, 2L]
    b_fused : [1, 2L]
    Returns (mu [B, L], log_var [B, L]) with no padding and no post-slices.
    """
    B, F = x.shape
    two_l = w_fused.shape[1]
    assert two_l % 2 == 0
    L = two_l // 2
    out_dtype = x.dtype
    itemsize = jnp.dtype(x.dtype).itemsize

    # Batch tile: each grid step should move >= ~2 MiB of HBM (x read + outputs
    # write) so the ~0.35 us per-step overhead is amortized; multiple of 8
    # sublanes; never larger than the (rounded-up) batch.
    if tb is None:
        bytes_per_row = (F + two_l) * itemsize
        target_step_bytes = 2 * 1024 * 1024
        tb = _round_up(max(target_step_bytes // max(bytes_per_row, 1), 1024), 8)
        tb = min(tb, 8192)
    tb = min(tb, _round_up(B, 8))
    assert tb % 8 == 0, "tb must be a multiple of 8 (f32 sublane tiling)"

    grid = (pl.cdiv(B, tb),)  # ragged last block: OOB output rows are masked

    # Scoped-VMEM budget: double-buffered x/mu/log_var tiles + (default
    # double-buffered) grid-invariant weights & bias. No-op at small shapes;
    # keeps large tiles compiling on v6e/v5e's 32/16 MiB scoped defaults.
    x_tile_b = tb * F * itemsize
    out_tile_b = tb * two_l * itemsize
    wb_b = (F * two_l + two_l) * jnp.dtype(w_fused.dtype).itemsize
    vmem_limit = max(2 * (x_tile_b + out_tile_b + wb_b) + (4 << 20), 32 << 20)
    vmem_limit = min(vmem_limit, 128 << 20)

    mu, log_var = pl.pallas_call(
        _fused_linear_kernel,
        out_shape=(
            jax.ShapeDtypeStruct((B, L), out_dtype),
            jax.ShapeDtypeStruct((B, L), out_dtype),
        ),
        grid=grid,
        in_specs=[
            pl.BlockSpec((tb, F), lambda i: (i, 0)),      # x: streamed per batch tile
            pl.BlockSpec((F, two_l), lambda i: (0, 0)),   # fused weights: grid-invariant
            pl.BlockSpec((1, two_l), lambda i: (0, 0)),   # fused bias:    grid-invariant
        ],
        out_specs=(
            pl.BlockSpec((tb, L), lambda i: (i, 0)),      # mu
            pl.BlockSpec((tb, L), lambda i: (i, 0)),      # log_var
        ),
        compiler_params=pltpu.CompilerParams(
            dimension_semantics=("parallel",),
            vmem_limit_bytes=int(vmem_limit),
        ),
    )(x, w_fused, b_fused)
    return mu, log_var


if __name__ == "__main__":
    # Small, deterministic setup: batch=8, feature_dim=32, latent_dim=16.
    B, F, L = 8, 32, 16
    key = jax.random.PRNGKey(0)
    kx, kw1, kb1, kw2, kb2 = jax.random.split(key, 5)

    x = jax.random.normal(kx, (B, F), dtype=jnp.float32)
    # Deterministic "Linear" parameters (synthetic init, not a checkpoint),
    # stored pre-transposed as [F, L].
    w1 = jax.random.normal(kw1, (F, L), dtype=jnp.float32) * 0.1
    b1 = jax.random.normal(kb1, (1, L), dtype=jnp.float32) * 0.1
    w2 = jax.random.normal(kw2, (F, L), dtype=jnp.float32) * 0.1
    b2 = jax.random.normal(kb2, (1, L), dtype=jnp.float32) * 0.1

    # Fuse ONCE (hoisted out of the per-call path).
    w_fused, b_fused = fuse_gaussian_params(w1, b1, w2, b2)
    w_fused, b_fused = jax.block_until_ready((w_fused, b_fused))

    mu, log_var = gaussian_parametrizer(x, w_fused, b_fused)
    jax.block_until_ready((mu, log_var))

    # Reference check against plain JAX (same math as torch nn.Linear).
    mu_ref = x @ w1 + b1
    lv_ref = x @ w2 + b2
    assert mu.shape == (B, L) and log_var.shape == (B, L)
    assert jnp.allclose(mu, mu_ref, atol=1e-5, rtol=1e-5)
    assert jnp.allclose(log_var, lv_ref, atol=1e-5, rtol=1e-5)

    # Second check: non-divisible batch + small explicit tile exercises the
    # ragged last block (Pallas-masked stores) on a multi-step grid.
    B2 = 20
    x2 = jax.random.normal(kx, (B2, F), dtype=jnp.float32)
    mu2, lv2 = gaussian_parametrizer(x2, w_fused, b_fused, tb=8)
    jax.block_until_ready((mu2, lv2))
    assert mu2.shape == (B2, L) and lv2.shape == (B2, L)
    assert jnp.allclose(mu2, x2 @ w1 + b1, atol=1e-5, rtol=1e-5)
    assert jnp.allclose(lv2, x2 @ w2 + b2, atol=1e-5, rtol=1e-5)

    print("KERNEL_OK")
</pallas_src>

<mosaic_0001>
module attributes {stable_mosaic.version = 11 : i64} {
  func.func @_fused_linear_kernel(%arg0: i32, %arg1: memref<8x32xf32, #tpu.memory_space<vmem>>, %arg2: memref<32x32xf32, #tpu.memory_space<vmem>>, %arg3: memref<1x32xf32, #tpu.memory_space<vmem>>, %arg4: memref<8x16xf32, #tpu.memory_space<vmem>>, %arg5: memref<8x16xf32, #tpu.memory_space<vmem>>) attributes {dimension_semantics = [#tpu.dimension_semantics<parallel>], iteration_bounds = array<i64: 1>, scalar_prefetch = 0 : i64, scratch_operands = 0 : i64, tpu.core_type = #tpu.core_type<tc>, window_params = [{transform_indices = @transform_0, window_bounds = array<i64: 8, 32>}, {pipeline_mode = #tpu.pipeline_mode<synchronous>, transform_indices = @transform_1, window_bounds = array<i64: 32, 32>}, {pipeline_mode = #tpu.pipeline_mode<synchronous>, transform_indices = @transform_2, window_bounds = array<i64: 1, 32>}, {transform_indices = @transform_3, window_bounds = array<i64: 8, 16>}, {transform_indices = @transform_4, window_bounds = array<i64: 8, 16>}]} {
    %c0 = arith.constant 0 : index
    %c0_0 = arith.constant 0 : index
    %0 = vector.load %arg1[%c0, %c0_0] : memref<8x32xf32, #tpu.memory_space<vmem>>, vector<8x32xf32>
    %c0_1 = arith.constant 0 : index
    %c0_2 = arith.constant 0 : index
    %1 = vector.load %arg2[%c0_1, %c0_2] : memref<32x32xf32, #tpu.memory_space<vmem>>, vector<32x32xf32>
    %cst = arith.constant dense<0.000000e+00> : vector<8x32xf32>
    %2 = tpu.matmul %0, %1, %cst {dimension_numbers = #tpu.dot_dimension_numbers<[1], [0], [0], [1], [0, 0, 1, 1], [], []>} : vector<8x32xf32>, vector<32x32xf32>, vector<8x32xf32> -> vector<8x32xf32>
    %c0_3 = arith.constant 0 : index
    %c0_4 = arith.constant 0 : index
    %3 = vector.load %arg3[%c0_3, %c0_4] : memref<1x32xf32, #tpu.memory_space<vmem>>, vector<1x32xf32>
    %4 = vector.broadcast %3 : vector<1x32xf32> to vector<8x32xf32>
    %5 = arith.addf %2, %4 : vector<8x32xf32>
    %6 = vector.extract_strided_slice %5 {offsets = [0, 0], sizes = [8, 16], strides = [1, 1]} : vector<8x32xf32> to vector<8x16xf32>
    %c0_5 = arith.constant 0 : index
    %c0_6 = arith.constant 0 : index
    %7 = vector.load %arg4[%c0_5, %c0_6] : memref<8x16xf32, #tpu.memory_space<vmem>>, vector<8x16xf32>
    tpu.vector_store %arg4[%c0_5, %c0_6], %6 {strides = array<i32>} : memref<8x16xf32, #tpu.memory_space<vmem>>, vector<8x16xf32>,
    %8 = vector.extract_strided_slice %5 {offsets = [0, 16], sizes = [8, 16], strides = [1, 1]} : vector<8x32xf32> to vector<8x16xf32>
    %c0_7 = arith.constant 0 : index
    %c0_8 = arith.constant 0 : index
    %9 = vector.load %arg5[%c0_7, %c0_8] : memref<8x16xf32, #tpu.memory_space<vmem>>, vector<8x16xf32>
    tpu.vector_store %arg5[%c0_7, %c0_8], %8 {strides = array<i32>} : memref<8x16xf32, #tpu.memory_space<vmem>>, vector<8x16xf32>,
    return
  }
  func.func @transform_0(%arg0: i32) -> (i32, i32) {
    %c0_i32 = arith.constant 0 : i32
    %c0_i32_0 = arith.constant 0 : i32
    return %arg0, %c0_i32 : i32, i32
  }
  func.func @transform_1(%arg0: i32) -> (i32, i32) {
    %c0_i32 = arith.constant 0 : i32
    %c0_i32_0 = arith.constant 0 : i32
    %c0_i32_1 = arith.constant 0 : i32
    return %c0_i32, %c0_i32_0 : i32, i32
  }
  func.func @transform_2(%arg0: i32) -> (i32, i32) {
    %c0_i32 = arith.constant 0 : i32
    %c0_i32_0 = arith.constant 0 : i32
    %c0_i32_1 = arith.constant 0 : i32
    return %c0_i32, %c0_i32_0 : i32, i32
  }
  func.func @transform_3(%arg0: i32) -> (i32, i32) {
    %c0_i32 = arith.constant 0 : i32
    %c0_i32_0 = arith.constant 0 : i32
    return %arg0, %c0_i32 : i32, i32
  }
  func.func @transform_4(%arg0: i32) -> (i32, i32) {
    %c0_i32 = arith.constant 0 : i32
    %c0_i32_0 = arith.constant 0 : i32
    return %arg0, %c0_i32 : i32, i32
  }
}

</mosaic_0001>

<bundles_post_ra>
// kernel: tpu_custom_call.1
= control target key start
LH: loop header
LB: loop body
LE: loop exit
PB: predicated region body
PF: predicated region fallthrough
CT: control target
= control target key end

     0   :  { %10 = vsyncpa [#allocation3], 0  ;;  %s392_s0 = inlined_call_operand.hbm [shape: f32[8,32], index: 0, kind: input, shape index: {}]   ;;  %s393_s1 = inlined_call_operand.hbm [shape: f32[32,32], index: 1, kind: input, shape index: {}]   ;;  %s394_s2 = inlined_call_operand.vmem [shape: f32[1,32], index: 2, kind: input, shape index: {}]   ;;  %s395_s3 = inlined_call_operand.hbm [shape: f32[8,16], index: 3, kind: output, shape index: {0}]   ;;  %s396_s4 = inlined_call_operand.hbm [shape: f32[8,16], index: 4, kind: output, shape index: {1}]  }
   0x1   :  { %11 = vsyncpa [#allocation6], 0 }
   0x2   :  { %12 = vsyncpa [#allocation4], 0 }
   0x3   :  { %13 = vsyncpa [#allocation9], 0  ;;  %s297_s15 = smov [#allocation2]   ;;  %s298_s17 = smov [#allocation5]  }
   0x4   :  { %s20_s16 = sshll.u32 %s297_s15, 4  ;;  %s29_s18 = sshll.u32 %s298_s17, 4  ;;  %s21_s16 = int_to_ptr.vmem [resolvable:$true] %s20_s16  ;;  %s332_s18 = int_to_ptr.vmem [resolvable:$true] %s29_s18 }
   0x5   :  { %s201_s21 = scalar_lea.hbm %s392_s0, 128 }
   0x6   :  { %p202_p0 = scmp.ne.s32.totalorder %s392_s0, %s201_s21  ;;  %p205_p1 = scmp.lt.u32.totalorder %s201_s21, %s392_s0 }
   0x8   :  { %p207_p2 = pnand %p205_p1, %p202_p0 }
   0xa   :  { %210 = shalt.err (!%p207_p2)
}
   0xb   :  { %s211_s26 = scalar_lea.vmem %s21_s16, 128  ;;  %p216_p4 = scmp.lt.s32.totalorder %s21_s16, %s21_s16 }
   0xc   :  { %p212_p3 = scmp.ne.s32.totalorder %s21_s16, %s211_s26  ;;  %p217_p5 = scmp.lt.s32.totalorder %s211_s26, %s211_s26 }
   0xe   :  { %p218_p6 = por %p217_p5, %p216_p4 }
  0x10   :  { %p219_p7 = pnand %p218_p6, %p212_p3 }
  0x12   :  { %222 = shalt.err (!%p219_p7)
}
  0x13   :  { %23 = dma.hbm_to_vmem [thread:$0]  %s392_s0, 128, %s21_s16, [#allocation3]  }
  0x14   :  { %s223_s5 = scalar_lea.hbm %s393_s1, 512 }
  0x15   :  { %p224_p8 = scmp.ne.s32.totalorder %s393_s1, %s223_s5  ;;  %p227_p9 = scmp.lt.u32.totalorder %s223_s5, %s393_s1 }
  0x17   :  { %p229_p10 = pnand %p227_p9, %p224_p8 }
  0x19   :  { %232 = shalt.err (!%p229_p10)
}
  0x1a   :  { %s233_s10 = scalar_lea.vmem %s332_s18, 512  ;;  %p238_p12 = scmp.lt.s32.totalorder %s332_s18, %s332_s18 }
  0x1b   :  { %p234_p11 = scmp.ne.s32.totalorder %s332_s18, %s233_s10  ;;  %p239_p13 = scmp.lt.s32.totalorder %s233_s10, %s233_s10 }
  0x1d   :  { %p240_p0 = por %p239_p13, %p238_p12 }
  0x1f   :  { %p241_p1 = pnand %p240_p0, %p234_p11 }
  0x21   :  { %244 = shalt.err (!%p241_p1)
}
  0x22   :  { %s299_s0 = smov 128   ;;  %s300_s11 = smov 8  }
  0x23   :  { %35 = dma.hbm_to_vmem [thread:$0]  %s393_s1, 512, %s332_s18, [#allocation6], %s299_s0, %s299_s0, %s300_s11  }
  0x24   :  { %289 = dma.done.wait [#allocation3], 128  }
  0x25   :  { %290 = vsyncadd [#allocation3], 4294967168 }
  0x26   :  { %291 = dma.done.wait [#allocation6], 512  }
  0x27   :  { %292 = vsyncadd [#allocation6], 4294966784  ;;  %v301_v0 = vmov 0.0|0.0   ;;  %vm302_vm0 = vmmov 0   ;;  %v303_v1 = vmov 0.0   ;;  %v45_v2 = vld [vmem:[#allocation5] sm:$0xff] }
  0x28   :  { %185 = vmatprep.subr.bf16.mxu0 %v301_v0  ;;  %182 = vmatprep.mubr.msk.f32.mxu0 %vm302_vm0, %v303_v1  ;;  %v46_v3 = vld [vmem:[#allocation5 + $0x8] sm:$0xff]  ;;  %v47_v4 = vld [vmem:[#allocation5 + $0x10] sm:$0xff]  ;;  %v48_v6 = vld [vmem:[#allocation5 + $0x18] sm:$0xff]  ;;  %vm56_vm1 = vcmask 261120   ;;  %s304_s15 = smov [#allocation7]   ;;  %vm130_vm2 = vcmask 130048  }
  0x29   :  { %v186_v5 = vpack.c.bf16 %v46_v3, %v45_v2  ;;  %v189_v7 = vpack.c.bf16 %v48_v6, %v47_v4  ;;  %v44_v8 = vld [vmem:[#allocation2] sm:$0xff]  ;;  %s143_s16 = sshll.u32 %s304_s15, 4  ;;  %s305_s17 = smov 112   ;;  %s144_s16 = int_to_ptr.vmem [resolvable:$true] %s143_s16 }
  0x2a   :  { %v167_v9 = vld [vmem:[%s394_s2] ss:$0 sm:$0xff]  ;;  %s245_s18 = scalar_lea.vmem %s144_s16, 128  ;;  %p250_p3 = scmp.lt.s32.totalorder %s144_s16, %s144_s16 }
  0x2b   :  { %187 = vmatpush3.bf16.msra.mxu0 %v186_v5  ;;  %p246_p2 = scmp.ne.s32.totalorder %s144_s16, %s245_s18  ;;  %p251_p4 = scmp.lt.s32.totalorder %s245_s18, %s245_s18 }
  0x2c   :  { %188 = vmatprep.subr.bf16.mxu0 %v301_v0 }
  0x2d   :  { %p252_p5 = por %p251_p4, %p250_p3 }
  0x2f   :  { %190 = vmatpush3.bf16.msra.mxu0 %v189_v7  ;;  %p253_p6 = pnand %p252_p5, %p246_p2 }
  0x32   :  { %183 = vmatmul.mubr.msk.f32.vlgmr.msra.gmra.mrb[0].mxu0 %vm56_vm1, %v44_v8 }
 0x105   :  { %v126_v10 = vpop.f32.mrb[0].mxu0 }
 0x106   :  { %v127_v11 = vadd.f32 %v167_v9, %v126_v10  ;;  %v184_v12 = vpop.f32.mrb[1].mxu0 }
 0x108   :  { %133 = vrot.lane.b32.xlu0 %v127_v11, %s305_s17  ;;  %131 = vst.msk [vmem:[#allocation7] sm:$0xff] %vm130_vm2, %v127_v11 }
 0x109   :  { %256 = shalt.err (!%p253_p6)
}
 0x10a   :  { %s257_s20 = scalar_lea.hbm %s395_s3, 128 }
 0x10b   :  { %p258_p7 = scmp.ne.s32.totalorder %s395_s3, %s257_s20  ;;  %p261_p8 = scmp.lt.u32.totalorder %s257_s20, %s395_s3 }
 0x10d   :  { %p263_p9 = pnand %p261_p8, %p258_p7 }
 0x10f   :  { %266 = shalt.err (!%p263_p9)
}
 0x110   :  { %146 = dma.vmem_to_hbm [thread:$0]  %s144_s16, 128, %s395_s3, [#allocation4]  }
 0x111   :  { %s306_s27 = smov [#allocation8]  }
 0x112   :  { %s153_s28 = sshll.u32 %s306_s27, 4  ;;  %s154_s28 = int_to_ptr.vmem [resolvable:$true] %s153_s28 }
 0x113   :  { %s267_s29 = scalar_lea.vmem %s154_s28, 128  ;;  %p272_p11 = scmp.lt.s32.totalorder %s154_s28, %s154_s28 }
 0x114   :  { %p268_p10 = scmp.ne.s32.totalorder %s154_s28, %s267_s29  ;;  %p273_p12 = scmp.lt.s32.totalorder %s267_s29, %s267_s29 }
 0x116   :  { %p274_p13 = por %p273_p12, %p272_p11 }
 0x118   :  { %p275_p0 = pnand %p274_p13, %p268_p10 }
 0x17a   :  { %v134_v13 = vpop.permute.xlu0 %133 }
 0x17b   :  { %136 = vst.msk [vmem:[#allocation8] sm:$0xff] %vm130_vm2, %v134_v13 }
 0x17c   :  { %278 = shalt.err (!%p275_p0)
}
 0x17d   :  { %s279_s6 = scalar_lea.hbm %s396_s4, 128 }
 0x17e   :  { %p280_p1 = scmp.ne.s32.totalorder %s396_s4, %s279_s6  ;;  %p283_p2 = scmp.lt.u32.totalorder %s279_s6, %s396_s4 }
 0x180   :  { %p285_p3 = pnand %p283_p2, %p280_p1 }
 0x182   :  { %288 = shalt.err (!%p285_p3)
}
 0x183   :  { %156 = dma.vmem_to_hbm [thread:$0]  %s154_s28, 128, %s396_s4, [#allocation9]  }
 0x184   :  { %293 = dma.done.wait [#allocation4], 128  }
 0x185   :  { %294 = vsyncadd [#allocation4], 4294967168 }
 0x186   :  { %295 = dma.done.wait [#allocation9], 128  }
 0x187   :  { %296 = vsyncadd [#allocation9], 4294967168 }
 0x188   :  { %163 = vsyncpa [#allocation3], 1 }
 0x189   :  { %164 = vsyncpa [#allocation6], 1 }
 0x18a   :  { %165 = vsyncpa [#allocation4], 1 }
 0x18b   :  { %166 = vsyncpa [#allocation9], 1 }

</bundles_post_ra>
